<compile_context>
chip_gen: v7x
topology: tpu7x:2x2x1
jax: 0.10.0
libtpu: 0.0.40
codegen_flags: <defaults>
</compile_context>

<pallas_src>
import math

import jax
import jax.numpy as jnp
from jax import lax
from jax.experimental import pallas as pl
from jax.experimental.pallas import tpu as pltpu


def _round_up(x: int, m: int) -> int:
    return ((x + m - 1) // m) * m


# ---------------------------------------------------------------------------
# One-time parameter preparation (do NOT redo per forward call).
# ---------------------------------------------------------------------------
def prepare_output_process_params(weight, bias, *, compute_dtype=None):
    """Prep nn.Linear params once.

    weight: (nfeats, latent_dim)  -- PyTorch nn.Linear layout
    bias:   (nfeats,)
    Returns (w_t, b2d):
      w_t: (latent_dim, nfeats)   -- MXU-stationary (K, N) layout
      b2d: (1, nfeats) float32    -- added to the f32 accumulator
    """
    w_t = jnp.asarray(weight).T                      # (K, N)
    if compute_dtype is not None:                    # e.g. jnp.bfloat16 on v5e
        w_t = w_t.astype(compute_dtype)
    b2d = jnp.asarray(bias).astype(jnp.float32).reshape(1, -1)
    return w_t, b2d


# ---------------------------------------------------------------------------
# Kernel: one M-tile of  y = x @ W^T + b  ==  x(tm,K) @ w_t(K,N) + b(1,N)
# ---------------------------------------------------------------------------
def _linear_kernel(x_ref, w_ref, b_ref, o_ref):
    x = x_ref[...]                                   # (TM, K)
    if x.dtype != w_ref.dtype:
        # In-kernel cast (handles bf16-compute and mixed x/weight dtypes);
        # stays hidden under the x DMA, no extra HBM pass in the wrapper.
        x = x.astype(w_ref.dtype)
    acc = lax.dot_general(
        x, w_ref[...],
        dimension_numbers=(((1,), (0,)), ((), ())),  # plain MK x KN, no RHS transpose
        preferred_element_type=jnp.float32,
    )
    o_ref[...] = (acc + b_ref[...]).astype(o_ref.dtype)


# ---------------------------------------------------------------------------
# VMEM-aware tile sizing.
# ---------------------------------------------------------------------------
_MIN_SPLIT_ROWS = 256   # force >=2 grid steps once M >= 2 * this (v7x: 2 TCs)


def _vmem_budget_bytes() -> int:
    try:
        cap = int(pltpu.get_tpu_info().vmem_capacity_bytes)
    except Exception:
        cap = 64 * 1024 * 1024        # conservative: v7x per-TC physical VMEM
    # Use half the physical capacity: 32 MiB on v7x, 64 MiB on v5e/v6e.
    return cap // 2


def _tile_footprint_bytes(tm, K, N, x_item, w_item, out_item) -> int:
    x_buf = 2 * tm * K * x_item       # double-buffered x stream
    o_buf = 2 * tm * N * out_item     # double-buffered output stream
    w_buf = K * N * w_item            # resident weight (single buffer)
    b_buf = N * 4                     # resident bias (f32)
    return x_buf + o_buf + w_buf + b_buf


def _pick_tile_rows(M, K, N, x_item, w_item, out_item, block_m, budget) -> int:
    tm = min(block_m, _round_up(M, 8))
    if M >= 2 * _MIN_SPLIT_ROWS:
        # Guarantee >=2 grid steps: shards across v7x's two TensorCores and
        # gives the pipeline something to overlap.
        tm = min(tm, _round_up(pl.cdiv(M, 2), 8))
    # Leave ~25% of the budget as headroom for compiler-internal scratch.
    avail = int(budget * 0.75)
    while tm > 8 and _tile_footprint_bytes(tm, K, N, x_item, w_item, out_item) > avail:
        tm = max(8, _round_up(tm // 2, 8))
    return tm


# ---------------------------------------------------------------------------
# Forward wrapper:  y = x @ weight.T + bias  over the last dim of x.
# ---------------------------------------------------------------------------
def output_process(x, w_t, b2d, *, block_m: int = 2048,
                   force_pallas: bool = False, min_rows_for_pallas: int = 512):
    """x: (..., latent_dim); w_t/b2d from prepare_output_process_params()."""
    K, N = w_t.shape
    assert x.shape[-1] == K, "latent_dim mismatch"
    lead_shape = x.shape[:-1]
    out_dtype = x.dtype

    x2d = x.reshape(-1, K)                            # (M, K)
    M = x2d.shape[0]

    # Tiny / skinny problems: a standalone custom call is pure overhead and
    # the MXU/lane utilisation is terrible — let XLA fuse a plain matmul.
    small = (M < min_rows_for_pallas) or (K < 128) or (N < 128)
    if small and not force_pallas:
        acc = lax.dot_general(x2d.astype(w_t.dtype), w_t,
                              dimension_numbers=(((1,), (0,)), ((), ())),
                              preferred_element_type=jnp.float32)
        return (acc + b2d).astype(out_dtype).reshape(*lead_shape, N)

    x_item = jnp.dtype(x2d.dtype).itemsize
    w_item = jnp.dtype(w_t.dtype).itemsize
    out_item = jnp.dtype(out_dtype).itemsize

    budget = _vmem_budget_bytes()
    tm = _pick_tile_rows(M, K, N, x_item, w_item, out_item, block_m, budget)
    grid = (pl.cdiv(M, tm),)

    # NOTE: when M % tm != 0 the last x block contains out-of-range rows; their
    # garbage results are clipped on writeback (row-wise only — do not add a
    # cross-row reduction to this kernel without masking).

    cost = pl.CostEstimate(
        flops=2 * M * K * N,
        bytes_accessed=(M * K * x_item + K * N * w_item + N * 4 + M * N * out_item),
        transcendentals=0,
    )

    def make(single_buffer_params: bool):
        param_kwargs = (dict(pipeline_mode=pl.Buffered(1))
                        if single_buffer_params else {})
        return pl.pallas_call(
            _linear_kernel,
            out_shape=jax.ShapeDtypeStruct((M, N), out_dtype),
            grid=grid,
            in_specs=[
                # x: streamed over M.
                pl.BlockSpec((tm, K), lambda i: (i, 0)),
                # weight / bias: VMEM-resident across the whole grid.
                pl.BlockSpec((K, N), lambda i: (0, 0), **param_kwargs),
                pl.BlockSpec((1, N), lambda i: (0, 0), **param_kwargs),
            ],
            # Unpadded, lane-dense-as-possible output: no pad + post-slice pass.
            out_specs=pl.BlockSpec((tm, N), lambda i: (i, 0)),
            compiler_params=pltpu.CompilerParams(
                dimension_semantics=("parallel",),     # shard M across TCs (v7x)
                vmem_limit_bytes=int(budget),
            ),
            cost_estimate=cost,
        )

    try:
        y2d = make(True)(x2d, w_t, b2d)
    except Exception:
        # pl.Buffered(1) unsupported on this JAX version — identical kernel,
        # default double-buffered params (costs one extra weight-sized buffer).
        y2d = make(False)(x2d, w_t, b2d)

    return y2d.reshape(*lead_shape, N)


if __name__ == "__main__":
    # --- Small shapes consistent with MDM's OutputProcess forward -----------
    seq, bs = 8, 2
    latent_dim, nfeats = 32, 4

    key = jax.random.PRNGKey(0)
    kx, kw, kb = jax.random.split(key, 3)

    bound = 1.0 / math.sqrt(latent_dim)
    weight = jax.random.uniform(kw, (nfeats, latent_dim), jnp.float32, -bound, bound)
    bias = jax.random.uniform(kb, (nfeats,), jnp.float32, -bound, bound)
    x = jax.random.normal(kx, (seq, bs, latent_dim), jnp.float32)

    w_t, b2d = prepare_output_process_params(weight, bias)
    # force_pallas: demo shapes are below the real-world threshold, but we want
    # to exercise the kernel here.
    y = output_process(x, w_t, b2d, force_pallas=True)
    jax.block_until_ready(y)

    y_ref = jnp.einsum("sbk,nk->sbn", x, weight) + bias
    assert y.shape == (seq, bs, nfeats)
    assert jnp.allclose(y, y_ref, atol=1e-5, rtol=1e-5)

    # --- Second check: multi-step grid + nfeats not a multiple of 128 -------
    seq2, bs2, K2, N2 = 16, 4, 128, 200
    kx2, kw2, kb2 = jax.random.split(jax.random.PRNGKey(1), 3)
    bound2 = 1.0 / math.sqrt(K2)
    w2 = jax.random.uniform(kw2, (N2, K2), jnp.float32, -bound2, bound2)
    b2 = jax.random.uniform(kb2, (N2,), jnp.float32, -bound2, bound2)
    x2 = jax.random.normal(kx2, (seq2, bs2, K2), jnp.float32)

    w2_t, b2_2d = prepare_output_process_params(w2, b2)
    y2 = output_process(x2, w2_t, b2_2d, force_pallas=True, block_m=32)  # 2 grid steps
    jax.block_until_ready(y2)

    y2_ref = jnp.einsum("sbk,nk->sbn", x2, w2) + b2
    assert y2.shape == (seq2, bs2, N2)
    assert jnp.allclose(y2, y2_ref, atol=1e-4, rtol=1e-4)

    print("KERNEL_OK")
</pallas_src>

<mosaic_0001>
module attributes {stable_mosaic.version = 11 : i64} {
  func.func @_linear_kernel(%arg0: i32, %arg1: memref<16x32xf32, #tpu.memory_space<vmem>>, %arg2: memref<32x4xf32, #tpu.memory_space<vmem>>, %arg3: memref<1x4xf32, #tpu.memory_space<vmem>>, %arg4: memref<16x4xf32, #tpu.memory_space<vmem>>) attributes {dimension_semantics = [#tpu.dimension_semantics<parallel>], iteration_bounds = array<i64: 1>, scalar_prefetch = 0 : i64, scratch_operands = 0 : i64, tpu.core_type = #tpu.core_type<tc>, window_params = [{transform_indices = @transform_0, window_bounds = array<i64: 16, 32>}, {pipeline_mode = #tpu.pipeline_mode<synchronous>, transform_indices = @transform_1, window_bounds = array<i64: 32, 4>}, {pipeline_mode = #tpu.pipeline_mode<synchronous>, transform_indices = @transform_2, window_bounds = array<i64: 1, 4>}, {transform_indices = @transform_3, window_bounds = array<i64: 16, 4>}]} {
    %c0 = arith.constant 0 : index
    %c0_0 = arith.constant 0 : index
    %0 = vector.load %arg1[%c0, %c0_0] : memref<16x32xf32, #tpu.memory_space<vmem>>, vector<16x32xf32>
    %c0_1 = arith.constant 0 : index
    %c0_2 = arith.constant 0 : index
    %1 = vector.load %arg2[%c0_1, %c0_2] : memref<32x4xf32, #tpu.memory_space<vmem>>, vector<32x4xf32>
    %cst = arith.constant dense<0.000000e+00> : vector<16x4xf32>
    %2 = tpu.matmul %0, %1, %cst {dimension_numbers = #tpu.dot_dimension_numbers<[1], [0], [0], [1], [0, 0, 1, 1], [], []>} : vector<16x32xf32>, vector<32x4xf32>, vector<16x4xf32> -> vector<16x4xf32>
    %c0_3 = arith.constant 0 : index
    %c0_4 = arith.constant 0 : index
    %3 = vector.load %arg3[%c0_3, %c0_4] : memref<1x4xf32, #tpu.memory_space<vmem>>, vector<1x4xf32>
    %4 = vector.broadcast %3 : vector<1x4xf32> to vector<16x4xf32>
    %5 = arith.addf %2, %4 : vector<16x4xf32>
    %c0_5 = arith.constant 0 : index
    %c0_6 = arith.constant 0 : index
    %6 = vector.load %arg4[%c0_5, %c0_6] : memref<16x4xf32, #tpu.memory_space<vmem>>, vector<16x4xf32>
    tpu.vector_store %arg4[%c0_5, %c0_6], %5 {strides = array<i32>} : memref<16x4xf32, #tpu.memory_space<vmem>>, vector<16x4xf32>,
    return
  }
  func.func @transform_0(%arg0: i32) -> (i32, i32) {
    %c0_i32 = arith.constant 0 : i32
    %c0_i32_0 = arith.constant 0 : i32
    return %arg0, %c0_i32 : i32, i32
  }
  func.func @transform_1(%arg0: i32) -> (i32, i32) {
    %c0_i32 = arith.constant 0 : i32
    %c0_i32_0 = arith.constant 0 : i32
    %c0_i32_1 = arith.constant 0 : i32
    return %c0_i32, %c0_i32_0 : i32, i32
  }
  func.func @transform_2(%arg0: i32) -> (i32, i32) {
    %c0_i32 = arith.constant 0 : i32
    %c0_i32_0 = arith.constant 0 : i32
    %c0_i32_1 = arith.constant 0 : i32
    return %c0_i32, %c0_i32_0 : i32, i32
  }
  func.func @transform_3(%arg0: i32) -> (i32, i32) {
    %c0_i32 = arith.constant 0 : i32
    %c0_i32_0 = arith.constant 0 : i32
    return %arg0, %c0_i32 : i32, i32
  }
}

module attributes {stable_mosaic.version = 11 : i64} {
  func.func @_linear_kernel(%arg0: i32, %arg1: memref<16x32xf32, #tpu.memory_space<vmem>>, %arg2: memref<32x4xf32, #tpu.memory_space<vmem>>, %arg3: memref<1x4xf32, #tpu.memory_space<vmem>>, %arg4: memref<16x4xf32, #tpu.memory_space<vmem>>) attributes {dimension_semantics = [#tpu.dimension_semantics<parallel>], iteration_bounds = array<i64: 1>, scalar_prefetch = 0 : i64, scratch_operands = 0 : i64, tpu.core_type = #tpu.core_type<tc>, window_params = [{transform_indices = @transform_0, window_bounds = array<i64: 16, 32>}, {pipeline_mode = #tpu.pipeline_mode<synchronous>, transform_indices = @transform_1, window_bounds = array<i64: 32, 4>}, {pipeline_mode = #tpu.pipeline_mode<synchronous>, transform_indices = @transform_2, window_bounds = array<i64: 1, 4>}, {transform_indices = @transform_3, window_bounds = array<i64: 16, 4>}]} {
    %c0 = arith.constant 0 : index
    %c0_0 = arith.constant 0 : index
    %0 = vector.load %arg1[%c0, %c0_0] : memref<16x32xf32, #tpu.memory_space<vmem>>, vector<16x32xf32>
    %c0_1 = arith.constant 0 : index
    %c0_2 = arith.constant 0 : index
    %1 = vector.load %arg2[%c0_1, %c0_2] : memref<32x4xf32, #tpu.memory_space<vmem>>, vector<32x4xf32>
    %cst = arith.constant dense<0.000000e+00> : vector<16x4xf32>
    %2 = tpu.matmul %0, %1, %cst {dimension_numbers = #tpu.dot_dimension_numbers<[1], [0], [0], [1], [0, 0, 1, 1], [], []>} : vector<16x32xf32>, vector<32x4xf32>, vector<16x4xf32> -> vector<16x4xf32>
    %c0_3 = arith.constant 0 : index
    %c0_4 = arith.constant 0 : index
    %3 = vector.load %arg3[%c0_3, %c0_4] : memref<1x4xf32, #tpu.memory_space<vmem>>, vector<1x4xf32>
    %4 = vector.broadcast %3 : vector<1x4xf32> to vector<16x4xf32>
    %5 = arith.addf %2, %4 : vector<16x4xf32>
    %c0_5 = arith.constant 0 : index
    %c0_6 = arith.constant 0 : index
    %6 = vector.load %arg4[%c0_5, %c0_6] : memref<16x4xf32, #tpu.memory_space<vmem>>, vector<16x4xf32>
    tpu.vector_store %arg4[%c0_5, %c0_6], %5 {strides = array<i32>} : memref<16x4xf32, #tpu.memory_space<vmem>>, vector<16x4xf32>,
    return
  }
  func.func @transform_0(%arg0: i32) -> (i32, i32) {
    %c0_i32 = arith.constant 0 : i32
    %c0_i32_0 = arith.constant 0 : i32
    return %arg0, %c0_i32 : i32, i32
  }
  func.func @transform_1(%arg0: i32) -> (i32, i32) {
    %c0_i32 = arith.constant 0 : i32
    %c0_i32_0 = arith.constant 0 : i32
    %c0_i32_1 = arith.constant 0 : i32
    return %c0_i32, %c0_i32_0 : i32, i32
  }
  func.func @transform_2(%arg0: i32) -> (i32, i32) {
    %c0_i32 = arith.constant 0 : i32
    %c0_i32_0 = arith.constant 0 : i32
    %c0_i32_1 = arith.constant 0 : i32
    return %c0_i32, %c0_i32_0 : i32, i32
  }
  func.func @transform_3(%arg0: i32) -> (i32, i32) {
    %c0_i32 = arith.constant 0 : i32
    %c0_i32_0 = arith.constant 0 : i32
    return %arg0, %c0_i32 : i32, i32
  }
}

</mosaic_0001>

<bundles_post_ra>
// kernel: tpu_custom_call.1
= control target key start
LH: loop header
LB: loop body
LE: loop exit
PB: predicated region body
PF: predicated region fallthrough
CT: control target
= control target key end

     0   :  { %vm27_vm0 = vcmask 261120   ;;  %vm109_vm1 = vcmask 31744   ;;  %s191_s1 = inlined_call_operand.vmem [shape: f32[32,4], index: 1, kind: input, shape index: {}]   ;;  %s192_s0 = inlined_call_operand.vmem [shape: f32[16,32], index: 0, kind: input, shape index: {}]   ;;  %s193_s2 = inlined_call_operand.vmem [shape: f32[1,4], index: 2, kind: input, shape index: {}]   ;;  %s194_s3 = inlined_call_operand.vmem [shape: f32[16,4], index: 3, kind: output, shape index: {}]  }
   0x1   :  { %v16_v0 = vld [vmem:[%s191_s1] sm:$0xff]  ;;  %v17_v1 = vld [vmem:[%s191_s1 + $0x8] sm:$0xff]  ;;  %v18_v2 = vld [vmem:[%s191_s1 + $0x10] sm:$0xff] }
   0x2   :  { %v136_v3 = vpack.c.bf16 %v17_v1, %v16_v0  ;;  %v19_v4 = vld [vmem:[%s191_s1 + $0x18] sm:$0xff]  ;;  %v14_v5 = vld [vmem:[%s192_s0] sm:$0xff]  ;;  %v15_v7 = vld [vmem:[%s192_s0 + $0x8] sm:$0xff] }
   0x3   :  { %v140_v6 = vpack.c.bf16 %v19_v4, %v18_v2  ;;  %133 = vmatprep.mubr.msk.f32.mxu0 %vm27_vm0, %v14_v5  ;;  %v116_v8 = vld [vmem:[%s193_s2] ss:$0 sm:$0xff] }
   0x4   :  { %137 = vmatprep.subr.bf16.mxu0 %v136_v3 }
   0x5   :  { %139 = vmatpush3.bf16.msra.mxu0 %v136_v3 }
   0x6   :  { %141 = vmatprep.subr.bf16.mxu0 %v140_v6 }
   0x9   :  { %143 = vmatpush3.bf16.msra.mxu0 %v140_v6 }
   0xc   :  { %134 = vmatmul.mubr.msk.f32.vlgmr.msra.gmra.mrb[0].mxu0 %vm27_vm0, %v15_v7 }
  0xdf   :  { %v135_v9 = vpop.f32.mrb[0].mxu0 }
  0xe0   :  { %v106_v10 = vadd.f32 %v135_v9, %v116_v8  ;;  %v100_v11 = vpop.f32.mrb[1].mxu0 }
  0xe1   :  { %v101_v12 = vadd.f32 %v116_v8, %v100_v11 }
  0xe2   :  { %111 = vst.msk [vmem:[%s194_s3 + $0x8] sm:$0xff] %vm109_vm1, %v106_v10 }
  0xe3   :  { %110 = vst.msk [vmem:[%s194_s3] sm:$0xff] %vm109_vm1, %v101_v12 }

// kernel: tpu_custom_call.1
= control target key start
LH: loop header
LB: loop body
LE: loop exit
PB: predicated region body
PF: predicated region fallthrough
CT: control target
= control target key end

     0   :  { %vm27_vm0 = vcmask 261120   ;;  %vm109_vm1 = vcmask 31744   ;;  %s191_s1 = inlined_call_operand.vmem [shape: f32[32,4], index: 1, kind: input, shape index: {}]   ;;  %s192_s0 = inlined_call_operand.vmem [shape: f32[16,32], index: 0, kind: input, shape index: {}]   ;;  %s193_s2 = inlined_call_operand.vmem [shape: f32[1,4], index: 2, kind: input, shape index: {}]   ;;  %s194_s3 = inlined_call_operand.vmem [shape: f32[16,4], index: 3, kind: output, shape index: {}]  }
   0x1   :  { %v16_v0 = vld [vmem:[%s191_s1] sm:$0xff]  ;;  %v17_v1 = vld [vmem:[%s191_s1 + $0x8] sm:$0xff]  ;;  %v18_v2 = vld [vmem:[%s191_s1 + $0x10] sm:$0xff] }
   0x2   :  { %v136_v3 = vpack.c.bf16 %v17_v1, %v16_v0  ;;  %v19_v4 = vld [vmem:[%s191_s1 + $0x18] sm:$0xff]  ;;  %v14_v5 = vld [vmem:[%s192_s0] sm:$0xff]  ;;  %v15_v7 = vld [vmem:[%s192_s0 + $0x8] sm:$0xff] }
   0x3   :  { %v140_v6 = vpack.c.bf16 %v19_v4, %v18_v2  ;;  %133 = vmatprep.mubr.msk.f32.mxu0 %vm27_vm0, %v14_v5  ;;  %v116_v8 = vld [vmem:[%s193_s2] ss:$0 sm:$0xff] }
   0x4   :  { %137 = vmatprep.subr.bf16.mxu0 %v136_v3 }
   0x5   :  { %139 = vmatpush3.bf16.msra.mxu0 %v136_v3 }
   0x6   :  { %141 = vmatprep.subr.bf16.mxu0 %v140_v6 }
   0x9   :  { %143 = vmatpush3.bf16.msra.mxu0 %v140_v6 }
   0xc   :  { %134 = vmatmul.mubr.msk.f32.vlgmr.msra.gmra.mrb[0].mxu0 %vm27_vm0, %v15_v7 }
  0xdf   :  { %v135_v9 = vpop.f32.mrb[0].mxu0 }
  0xe0   :  { %v106_v10 = vadd.f32 %v135_v9, %v116_v8  ;;  %v100_v11 = vpop.f32.mrb[1].mxu0 }
  0xe1   :  { %v101_v12 = vadd.f32 %v116_v8, %v100_v11 }
  0xe2   :  { %111 = vst.msk [vmem:[%s194_s3 + $0x8] sm:$0xff] %vm109_vm1, %v106_v10 }
  0xe3   :  { %110 = vst.msk [vmem:[%s194_s3] sm:$0xff] %vm109_vm1, %v101_v12 }

</bundles_post_ra>
